<compile_context>
chip_gen: v6e
topology: v6e:2x2x1
jax: 0.10.0
libtpu: 0.0.40
codegen_flags: <defaults>
</compile_context>

<pallas_src>
import functools

import jax
import jax.numpy as jnp
from jax.experimental import pallas as pl
from jax.experimental.pallas import tpu as pltpu


def _vq_kernel(x_ref, emb_ref, embt_ref, e2_ref,
               quant_ref, idx_ref, counts_ref, sse_ref):
    x = x_ref[0].astype(jnp.float32)        # (D, T): channels x pixels
    e = emb_ref[...].astype(jnp.float32)    # (K, D)
    et = embt_ref[...].astype(jnp.float32)  # (D, K)  (precomputed transpose)
    e2 = e2_ref[...]                        # (K, 1)  (precomputed ||e_k||^2)
    k = e.shape[0]

    # scores[k, p] = ||e_k||^2 - 2 e_k . x_p.  The per-pixel ||x_p||^2 term is
    # constant across codes and cannot change the argmin, so it is dropped.
    ex = jnp.dot(e, x, preferred_element_type=jnp.float32)         # (K, T)
    scores = e2 - 2.0 * ex

    # argmin over codes (first index on ties, matching torch.argmin).
    smin = jnp.min(scores, axis=0, keepdims=True)                  # (1, T)
    row = jax.lax.broadcasted_iota(jnp.int32, scores.shape, 0)     # (K, T)
    idx = jnp.min(jnp.where(scores == smin, row, k), axis=0,
                  keepdims=True)                                   # (1, T)

    # One-hot stays in VMEM only; codebook gather via matmul.
    enc = (row == idx).astype(jnp.float32)                         # (K, T)
    quant = jnp.dot(et, enc, preferred_element_type=jnp.float32)   # (D, T)

    quant_ref[0] = quant.astype(quant_ref.dtype)                   # lane-dense
    idx_ref[0] = idx                                               # lane-dense

    # Per-tile partial reductions; summed (tiny) in the wrapper.
    counts_ref[...] = jnp.sum(enc, axis=1, keepdims=True).reshape(1, k, 1)
    diff = quant - x
    sse_ref[...] = jnp.sum(diff * diff, keepdims=True).reshape(1, 1, 1)


def _pick_spatial_tile(hw, d, k):
    """Largest multiple-of-128 divisor of H*W whose per-tile working set stays
    within a conservative VMEM budget (safe for v7x's 64 MiB VMEM); falls back
    to a single full-width tile if H*W is not 128-aligned."""
    if hw % 128 != 0:
        return hw
    bytes_per_px = 4 * (2 * d + 4 * k + 8)   # x, quant, scores/enc temps, idx
    budget = 4 * 1024 * 1024
    best = 128
    t = 128
    while t <= hw:
        if hw % t == 0 and t * bytes_per_px <= budget:
            best = t
        t += 128
    return best


@functools.partial(jax.jit, static_argnames=("num_embeddings", "commitment_cost"))
def vector_quantizer_forward(inputs_nchw, embedding, *, num_embeddings,
                             commitment_cost):
    """Forward pass matching the PyTorch VectorQuantizer.

    inputs_nchw: (B, D, H, W) float32
    embedding:   (K, D) float32 codebook
    Returns (loss, quantized_nchw, perplexity, encodings).
    """
    b, d, h, w = inputs_nchw.shape
    k = num_embeddings
    assert embedding.shape == (k, d)
    hw = h * w
    n = b * hw

    x3 = inputs_nchw.reshape(b, d, hw)           # free view of NCHW, no transpose
    emb_t = embedding.T                           # (D, K), tiny
    e2 = jnp.sum(embedding * embedding, axis=1, keepdims=True)    # (K, 1), hoisted

    t = _pick_spatial_tile(hw, d, k)
    n_t = hw // t
    grid = (b, n_t)

    quant3, idx3, counts_part, sse_part = pl.pallas_call(
        _vq_kernel,
        out_shape=(
            jax.ShapeDtypeStruct((b, d, hw), jnp.float32),       # quantized (NCHW view)
            jax.ShapeDtypeStruct((b, 1, hw), jnp.int32),         # code indices
            jax.ShapeDtypeStruct((b * n_t, k, 1), jnp.float32),  # per-tile code counts
            jax.ShapeDtypeStruct((b * n_t, 1, 1), jnp.float32),  # per-tile SSE
        ),
        grid_spec=pltpu.PrefetchScalarGridSpec(
            num_scalar_prefetch=0,
            grid=grid,
            in_specs=[
                pl.BlockSpec((1, d, t), lambda bi, ti: (bi, 0, ti)),
                pl.BlockSpec((k, d), lambda bi, ti: (0, 0)),
                pl.BlockSpec((d, k), lambda bi, ti: (0, 0)),
                pl.BlockSpec((k, 1), lambda bi, ti: (0, 0)),
            ],
            out_specs=[
                pl.BlockSpec((1, d, t), lambda bi, ti: (bi, 0, ti)),
                pl.BlockSpec((1, 1, t), lambda bi, ti: (bi, 0, ti)),
                pl.BlockSpec((1, k, 1), lambda bi, ti: (bi * n_t + ti, 0, 0)),
                pl.BlockSpec((1, 1, 1), lambda bi, ti: (bi * n_t + ti, 0, 0)),
            ],
        ),
        compiler_params=pltpu.CompilerParams(
            dimension_semantics=("parallel", "parallel"),
            vmem_limit_bytes=32 * 1024 * 1024,
        ),
    )(x3, embedding, emb_t, e2)

    # Final (tiny) reductions in plain JAX.
    counts = jnp.sum(counts_part, axis=(0, 2))                    # (K,)
    sse = jnp.sum(sse_part)
    mse = sse / (n * d)
    # Forward value of q_latent_loss == e_latent_loss == mse (detach only
    # affects gradients), so loss = (1 + commitment_cost) * mse.
    loss = (1.0 + commitment_cost) * mse

    avg_probs = counts / n
    perplexity = jnp.exp(-jnp.sum(avg_probs * jnp.log(avg_probs + 1e-10)))

    # Indices are already in the NHWC row order the PyTorch module uses for
    # `encodings` (row = b*H*W + h*W + w); build the one-hot lane-dense in XLA.
    encodings = jax.nn.one_hot(idx3.reshape(n), k, dtype=jnp.float32)

    # Straight-through estimator is the identity in the forward pass.
    # TODO(synk): backward / straight-through (detach) gradients are not implemented.
    quantized_nchw = quant3.reshape(b, d, h, w)
    return loss, quantized_nchw, perplexity, encodings


def _reference_forward(inputs_nchw, embedding, commitment_cost):
    """Pure-JAX mirror of the PyTorch forward (exact argmin) for verification."""
    b, d, h, w = inputs_nchw.shape
    inputs = jnp.transpose(inputs_nchw, (0, 2, 3, 1))
    flat = inputs.reshape(-1, d)
    dist = (jnp.sum(flat ** 2, axis=1, keepdims=True)
            + jnp.sum(embedding ** 2, axis=1)
            - 2.0 * flat @ embedding.T)
    idx = jnp.argmin(dist, axis=1)
    enc = jax.nn.one_hot(idx, embedding.shape[0], dtype=jnp.float32)
    quant = (enc @ embedding).reshape(inputs.shape)
    mse = jnp.mean((quant - inputs) ** 2)
    loss = (1.0 + commitment_cost) * mse
    avg_probs = jnp.mean(enc, axis=0)
    perplexity = jnp.exp(-jnp.sum(avg_probs * jnp.log(avg_probs + 1e-10)))
    return loss, jnp.transpose(quant, (0, 3, 1, 2)), perplexity, enc


if __name__ == "__main__":
    # Module config
    num_embeddings = 16
    embedding_dim = 4
    commitment_cost = 0.25

    # Deterministic params + inputs
    key = jax.random.PRNGKey(0)
    k_emb, k_x = jax.random.split(key)
    embedding = jax.random.uniform(
        k_emb, (num_embeddings, embedding_dim), jnp.float32,
        minval=-1.0 / num_embeddings, maxval=1.0 / num_embeddings)
    x = jax.random.normal(k_x, (2, embedding_dim, 16, 16), jnp.float32)  # NCHW

    loss, quantized, perplexity, encodings = vector_quantizer_forward(
        x, embedding, num_embeddings=num_embeddings,
        commitment_cost=commitment_cost)
    jax.block_until_ready((loss, quantized, perplexity, encodings))

    # ---- verification (tie-robust: codes drawn from a tiny range can be
    #      near-equidistant, so we check optimality + self-consistency) ----
    b, d, h, w = x.shape
    n = b * h * w
    flat = jnp.transpose(x, (0, 2, 3, 1)).reshape(-1, d)          # NHWC row order
    dist = (jnp.sum(flat ** 2, axis=1, keepdims=True)
            + jnp.sum(embedding ** 2, axis=1)
            - 2.0 * flat @ embedding.T)

    assert quantized.shape == x.shape
    assert encodings.shape == (n, num_embeddings)

    # 1) every selected code is (numerically) a minimizer of the distances.
    idx_k = jnp.argmax(encodings, axis=1)
    chosen = jnp.take_along_axis(dist, idx_k[:, None], axis=1)[:, 0]
    assert bool(jnp.all(chosen <= jnp.min(dist, axis=1) + 1e-4))

    # 2) quantized output is exactly the selected codebook rows (NCHW layout).
    quant_expect = jnp.transpose(
        embedding[idx_k].reshape(b, h, w, d), (0, 3, 1, 2))
    assert jnp.allclose(quantized, quant_expect, atol=1e-5)

    # 3) loss / perplexity consistent with the kernel's own assignment.
    mse_k = jnp.mean((embedding[idx_k] - flat) ** 2)
    loss_expect = (1.0 + commitment_cost) * mse_k
    assert jnp.allclose(loss, loss_expect, atol=1e-5, rtol=1e-5), (loss, loss_expect)
    avg_probs = jnp.mean(encodings, axis=0)
    perp_expect = jnp.exp(-jnp.sum(avg_probs * jnp.log(avg_probs + 1e-10)))
    assert jnp.allclose(perplexity, perp_expect, atol=1e-4, rtol=1e-4)

    # 4) and against the exact-argmin pure-JAX reference (loss is insensitive
    #    to tie-breaking, so a tight-ish tolerance is safe).
    loss_ref, _, _, _ = _reference_forward(x, embedding, commitment_cost)
    assert jnp.allclose(loss, loss_ref, atol=1e-3, rtol=1e-3), (loss, loss_ref)

    print("KERNEL_OK")
</pallas_src>

<mosaic_0001>
module attributes {stable_mosaic.version = 11 : i64} {
  func.func @_vq_kernel(%arg0: i32, %arg1: i32, %arg2: memref<1x4x256xf32, #tpu.memory_space<vmem>>, %arg3: memref<16x4xf32, #tpu.memory_space<vmem>>, %arg4: memref<4x16xf32, #tpu.memory_space<vmem>>, %arg5: memref<16x1xf32, #tpu.memory_space<vmem>>, %arg6: memref<1x4x256xf32, #tpu.memory_space<vmem>>, %arg7: memref<1x1x256xi32, #tpu.memory_space<vmem>>, %arg8: memref<1x16x1xf32, #tpu.memory_space<vmem>>, %arg9: memref<1x1x1xf32, #tpu.memory_space<vmem>>) attributes {dimension_semantics = [#tpu.dimension_semantics<parallel>, #tpu.dimension_semantics<parallel>], iteration_bounds = array<i64: 2, 1>, scalar_prefetch = 0 : i64, scratch_operands = 0 : i64, tpu.core_type = #tpu.core_type<tc>, window_params = [{transform_indices = @transform_0, window_bounds = array<i64: 1, 4, 256>}, {pipeline_mode = #tpu.pipeline_mode<synchronous>, transform_indices = @transform_1, window_bounds = array<i64: 16, 4>}, {pipeline_mode = #tpu.pipeline_mode<synchronous>, transform_indices = @transform_2, window_bounds = array<i64: 4, 16>}, {pipeline_mode = #tpu.pipeline_mode<synchronous>, transform_indices = @transform_3, window_bounds = array<i64: 16, 1>}, {transform_indices = @transform_4, window_bounds = array<i64: 1, 4, 256>}, {transform_indices = @transform_5, window_bounds = array<i64: 1, 1, 256>}, {transform_indices = @transform_6, window_bounds = array<i64: 1, 16, 1>}, {transform_indices = @transform_7, window_bounds = array<i64: 1, 1, 1>}]} {
    %c0 = arith.constant 0 : index
    %c0_0 = arith.constant 0 : index
    %c0_1 = arith.constant 0 : index
    %0 = vector.load %arg2[%c0, %c0_0, %c0_1] : memref<1x4x256xf32, #tpu.memory_space<vmem>>, vector<1x4x256xf32>
    %1 = vector.shape_cast %0 : vector<1x4x256xf32> to vector<4x256xf32>
    %c0_2 = arith.constant 0 : index
    %c0_3 = arith.constant 0 : index
    %2 = vector.load %arg3[%c0_2, %c0_3] : memref<16x4xf32, #tpu.memory_space<vmem>>, vector<16x4xf32>
    %c0_4 = arith.constant 0 : index
    %c0_5 = arith.constant 0 : index
    %3 = vector.load %arg4[%c0_4, %c0_5] : memref<4x16xf32, #tpu.memory_space<vmem>>, vector<4x16xf32>
    %c0_6 = arith.constant 0 : index
    %c0_7 = arith.constant 0 : index
    %4 = vector.load %arg5[%c0_6, %c0_7] : memref<16x1xf32, #tpu.memory_space<vmem>>, vector<16x1xf32>
    %cst = arith.constant dense<0.000000e+00> : vector<16x256xf32>
    %5 = tpu.matmul %2, %1, %cst {dimension_numbers = #tpu.dot_dimension_numbers<[1], [0], [0], [1], [0, 0, 1, 1], [], []>} : vector<16x4xf32>, vector<4x256xf32>, vector<16x256xf32> -> vector<16x256xf32>
    %cst_8 = arith.constant 2.000000e+00 : f32
    %6 = vector.broadcast %cst_8 : f32 to vector<16x256xf32>
    %7 = arith.mulf %6, %5 : vector<16x256xf32>
    %8 = vector.broadcast %4 : vector<16x1xf32> to vector<16x256xf32>
    %9 = arith.subf %8, %7 : vector<16x256xf32>
    %cst_9 = arith.constant dense<0x7F800000> : vector<256xf32>
    %10 = vector.multi_reduction <minimumf>, %9, %cst_9 [0] : vector<16x256xf32> to vector<256xf32>
    %11 = vector.shape_cast %10 : vector<256xf32> to vector<1x256xf32>
    %12 = tpu.iota {dimensions = array<i32: 0>} : vector<16x256xi32>
    %13 = vector.broadcast %11 : vector<1x256xf32> to vector<16x256xf32>
    %14 = arith.cmpf oeq, %9, %13 : vector<16x256xf32>
    %c16_i32 = arith.constant 16 : i32
    %15 = vector.broadcast %c16_i32 : i32 to vector<16x256xi32>
    %16 = arith.select %14, %12, %15 : vector<16x256xi1>, vector<16x256xi32>
    %cst_10 = arith.constant dense<2147483647> : vector<256xi32>
    %17 = vector.multi_reduction <minsi>, %16, %cst_10 [0] : vector<16x256xi32> to vector<256xi32>
    %18 = vector.shape_cast %17 : vector<256xi32> to vector<1x256xi32>
    %19 = vector.broadcast %18 : vector<1x256xi32> to vector<16x256xi32>
    %20 = arith.cmpi eq, %12, %19 : vector<16x256xi32>
    %21 = arith.extui %20 : vector<16x256xi1> to vector<16x256xi32>
    %22 = arith.sitofp %21 : vector<16x256xi32> to vector<16x256xf32>
    %cst_11 = arith.constant dense<0.000000e+00> : vector<4x256xf32>
    %23 = tpu.matmul %3, %22, %cst_11 {dimension_numbers = #tpu.dot_dimension_numbers<[1], [0], [0], [1], [0, 0, 1, 1], [], []>} : vector<4x16xf32>, vector<16x256xf32>, vector<4x256xf32> -> vector<4x256xf32>
    %c0_12 = arith.constant 0 : index
    %c0_13 = arith.constant 0 : index
    %c0_14 = arith.constant 0 : index
    %24 = vector.load %arg6[%c0_12, %c0_13, %c0_14] : memref<1x4x256xf32, #tpu.memory_space<vmem>>, vector<1x4x256xf32>
    %25 = vector.shape_cast %24 : vector<1x4x256xf32> to vector<4x256xf32>
    %26 = vector.shape_cast %23 : vector<4x256xf32> to vector<1x4x256xf32>
    tpu.vector_store %arg6[%c0_12, %c0_13, %c0_14], %26 {strides = array<i32>} : memref<1x4x256xf32, #tpu.memory_space<vmem>>, vector<1x4x256xf32>,
    %c0_15 = arith.constant 0 : index
    %c0_16 = arith.constant 0 : index
    %c0_17 = arith.constant 0 : index
    %27 = vector.load %arg7[%c0_15, %c0_16, %c0_17] : memref<1x1x256xi32, #tpu.memory_space<vmem>>, vector<1x1x256xi32>
    %28 = vector.shape_cast %27 : vector<1x1x256xi32> to vector<1x256xi32>
    %29 = vector.shape_cast %18 : vector<1x256xi32> to vector<1x1x256xi32>
    tpu.vector_store %arg7[%c0_15, %c0_16, %c0_17], %29 {strides = array<i32>} : memref<1x1x256xi32, #tpu.memory_space<vmem>>, vector<1x1x256xi32>,
    %cst_18 = arith.constant dense<0.000000e+00> : vector<16xf32>
    %30 = vector.multi_reduction <add>, %22, %cst_18 [1] : vector<16x256xf32> to vector<16xf32>
    %31 = vector.shape_cast %30 : vector<16xf32> to vector<16x1xf32>
    %32 = vector.shape_cast %31 : vector<16x1xf32> to vector<1x16x1xf32>
    %c0_19 = arith.constant 0 : index
    %c0_20 = arith.constant 0 : index
    %c0_21 = arith.constant 0 : index
    %33 = vector.load %arg8[%c0_19, %c0_20, %c0_21] : memref<1x16x1xf32, #tpu.memory_space<vmem>>, vector<1x16x1xf32>
    tpu.vector_store %arg8[%c0_19, %c0_20, %c0_21], %32 {strides = array<i32>} : memref<1x16x1xf32, #tpu.memory_space<vmem>>, vector<1x16x1xf32>,
    %34 = arith.subf %23, %1 : vector<4x256xf32>
    %35 = arith.mulf %34, %34 : vector<4x256xf32>
    %36 = vector.shape_cast %35 : vector<4x256xf32> to vector<1x4x256xf32>
    %cst_22 = arith.constant dense<0.000000e+00> : vector<1xf32>
    %37 = vector.multi_reduction <add>, %36, %cst_22 [1, 2] : vector<1x4x256xf32> to vector<1xf32>
    %38 = vector.shape_cast %37 : vector<1xf32> to vector<1x1x1xf32>
    %39 = vector.extract %38[0, 0, 0] : f32 from vector<1x1x1xf32>
    %40 = vector.broadcast %39 : f32 to vector<1x1xf32>
    %41 = vector.shape_cast %40 : vector<1x1xf32> to vector<1x1x1xf32>
    %c0_23 = arith.constant 0 : index
    %c0_24 = arith.constant 0 : index
    %c0_25 = arith.constant 0 : index
    %42 = vector.load %arg9[%c0_23, %c0_24, %c0_25] : memref<1x1x1xf32, #tpu.memory_space<vmem>>, vector<1x1x1xf32>
    tpu.vector_store %arg9[%c0_23, %c0_24, %c0_25], %41 {strides = array<i32>} : memref<1x1x1xf32, #tpu.memory_space<vmem>>, vector<1x1x1xf32>,
    return
  }
  func.func @transform_0(%arg0: i32, %arg1: i32) -> (i32, i32, i32) {
    %c0_i32 = arith.constant 0 : i32
    %c0_i32_0 = arith.constant 0 : i32
    return %arg0, %c0_i32, %arg1 : i32, i32, i32
  }
  func.func @transform_1(%arg0: i32, %arg1: i32) -> (i32, i32) {
    %c0_i32 = arith.constant 0 : i32
    %c0_i32_0 = arith.constant 0 : i32
    %c0_i32_1 = arith.constant 0 : i32
    return %c0_i32, %c0_i32_0 : i32, i32
  }
  func.func @transform_2(%arg0: i32, %arg1: i32) -> (i32, i32) {
    %c0_i32 = arith.constant 0 : i32
    %c0_i32_0 = arith.constant 0 : i32
    %c0_i32_1 = arith.constant 0 : i32
    return %c0_i32, %c0_i32_0 : i32, i32
  }
  func.func @transform_3(%arg0: i32, %arg1: i32) -> (i32, i32) {
    %c0_i32 = arith.constant 0 : i32
    %c0_i32_0 = arith.constant 0 : i32
    %c0_i32_1 = arith.constant 0 : i32
    return %c0_i32, %c0_i32_0 : i32, i32
  }
  func.func @transform_4(%arg0: i32, %arg1: i32) -> (i32, i32, i32) {
    %c0_i32 = arith.constant 0 : i32
    %c0_i32_0 = arith.constant 0 : i32
    return %arg0, %c0_i32, %arg1 : i32, i32, i32
  }
  func.func @transform_5(%arg0: i32, %arg1: i32) -> (i32, i32, i32) {
    %c0_i32 = arith.constant 0 : i32
    %c0_i32_0 = arith.constant 0 : i32
    return %arg0, %c0_i32, %arg1 : i32, i32, i32
  }
  func.func @transform_6(%arg0: i32, %arg1: i32) -> (i32, i32, i32) {
    %c1_i32 = arith.constant 1 : i32
    %0 = arith.muli %arg0, %c1_i32 : i32
    %1 = arith.addi %0, %arg1 : i32
    %c0_i32 = arith.constant 0 : i32
    %c0_i32_0 = arith.constant 0 : i32
    %c0_i32_1 = arith.constant 0 : i32
    return %1, %c0_i32, %c0_i32_0 : i32, i32, i32
  }
  func.func @transform_7(%arg0: i32, %arg1: i32) -> (i32, i32, i32) {
    %c1_i32 = arith.constant 1 : i32
    %0 = arith.muli %arg0, %c1_i32 : i32
    %1 = arith.addi %0, %arg1 : i32
    %c0_i32 = arith.constant 0 : i32
    %c0_i32_0 = arith.constant 0 : i32
    %c0_i32_1 = arith.constant 0 : i32
    return %1, %c0_i32, %c0_i32_0 : i32, i32, i32
  }
}

</mosaic_0001>

<bundles_post_ra>
// kernel: vector_quantizer_forward.1
= control target key start
LH: loop header
LB: loop body
LE: loop exit
PB: predicated region body
PF: predicated region fallthrough
CT: control target
= control target key end

     0   :  { %s998_s24 = smov 0   ;;  %s1000_s25 = smov 0   ;;  %s1102_s0 = inlined_call_operand.vmem [shape: f32[2,4,256], index: 0, kind: input, shape index: {}]   ;;  %s1103_s1 = inlined_call_operand.vmem [shape: f32[16,4], index: 1, kind: input, shape index: {}]   ;;  %s1104_s2 = inlined_call_operand.vmem [shape: f32[4,16], index: 2, kind: input, shape index: {}]   ;;  %s1105_s3 = inlined_call_operand.vmem [shape: f32[16,1], index: 3, kind: input, shape index: {}]   ;;  %s1106_s4 = inlined_call_operand.vmem [shape: f32[2,4,256], index: 4, kind: output, shape index: {0}]   ;;  %s1107_s5 = inlined_call_operand.vmem [shape: s32[2,1,256], index: 5, kind: output, shape index: {1}]   ;;  %s1108_s6 = inlined_call_operand.vmem [shape: f32[2,16,1], index: 6, kind: output, shape index: {2}]   ;;  %s1109_s7 = inlined_call_operand.vmem [shape: f32[2,1,1], index: 7, kind: output, shape index: {3}]  }
   0x1   :  { %s1002_s26 = smov 0  }
   0x2 LB: > { %s30_s27 = sadd.s32 1, %s948_s25  ;;  %p872_p0 = scmp.ge.s32.totalorder %s952_s26, 1  ;;  %s952_s26 = sphi %s1002_s26, %s18_s26   ;;  %s948_s25 = sphi %s1000_s25, %s1111_s25   ;;  %s944_s24 = sphi %s998_s24, %s1110_s24  }
   0x3   : > { %p32_p1 = scmp.ge.s32.totalorder %s30_s27, 2  ;;  %p271_p2 = scmp.lt.s32.totalorder %s952_s26, 3 }
   0x5   : > { %s1113_s27 = smov (%p32_p1, %s30_s27), 0  ;;  %p272_p3 = pnand %p872_p0, %p271_p2 }
   0x6   : > { %p330_p4 = scmp.lt.s32.totalorder (!%p272_p3), %s944_s24, 1 }
   0x7   : > { %275 = sbr.rel (%p272_p3) target bundleno = 662 (0x296), region = 36 }
   0xc   : > { %v954_v0 = vmov 0.0   ;;  %v374_v1 = vld [vmem:[%s1105_s3] sm:$0xff]  ;;  %s1115_s24 = smov (!%p330_p4, %s944_s24), 1  ;;  %v955_v2 = vmov 0   ;;  %v375_v3 = vld [vmem:[%s1105_s3 + $0x8] sm:$0xff]  ;;  %vm385_vm0 = vcmask 1043456   ;;  %v499_v25 = vlaneseq }
   0xd   : > { %454 = vmatprep.mubr.f32.mxu0 %v954_v0  ;;  %612 = vmatprep.mubr.f32.mxu1 %v954_v0  ;;  %s895_s30 = sshll.u32 %s1115_s24, 3  ;;  %v371_v6 = vld [vmem:[%s1103_s1] sm:$0xff]  ;;  %vm378_vm1 = vcmask 31744   ;;  %v372_v7 = vld [vmem:[%s1103_s1 + $0x8] sm:$0xff]  ;;  %v956_v49 = vmov 1966171168   ;;  %s368_s13 = scalar_lea.vmem %s1109_s7, %s1115_s24 }
   0xe   : > { %928 = vset.pattern.permute.xlu0 %v955_v2  ;;  %s337_s12 = scalar_lea.vmem %s1102_s0, %s895_s30  ;;  %v1050_v30 = vshrl.u32 %v499_v25, 7  ;;  %v626_v50 = vunpack.c.l.s4 %v956_v49  ;;  %s877_s17 = sshll.u32 %s1115_s24, 1  ;;  %v957_v63 = vmov 1.0  }
   0xf   : > { %473 = vperm.xlu0 %928, %v374_v1   ;;  %v1032_v4 = vld [vmem:[%s337_s12] sm:$0xff]  ;;  %s356_s22 = scalar_lea.vmem %s1107_s5, %s877_s17  ;;  %s897_s23 = sshll.u32 %s1115_s24, 4 }
  0x10   : > { %v1036_v5 = vcombine.high %v1032_v4, %v1032_v4  ;;  %v501_v35 = vadd.s32 8, %v1050_v30  ;;  %v627_v55 = vunpack.c.0.s8 %v626_v50  ;;  %s363_s8 = scalar_lea.vmem %s1108_s6, %s897_s23  ;;  %s347_s11 = scalar_lea.vmem %s1106_s4, %s895_s30 }
  0x12   : > { %880 = vmatprep.subr.msk.mxu0 %vm385_vm0, %v1036_v5  ;;  %v630_v59 = vsub.s32 %v627_v55, %v1050_v30 }
  0x13   : > { %478 = vperm.xlu0 %928, %v375_v3   ;;  %881 = vmatpush1.msk.msra.mxu0 %vm385_vm0, %v1032_v4 }
  0x14   : > { %882 = vmatmul.mubr.msk.f32.vlgmr.msra.gmra.mxu0 %vm378_vm1, %v371_v6 }
  0x15   : > { %460 = vmatprep.mubr.f32.mxu0 %v954_v0 }
  0x18   : > { %883 = vmatmul.mubr.msk.f32.gmra.mxu0 %vm378_vm1, %v372_v7 }
  0x8a   : > { %v474_v8 = vpop.permute.xlu0 %473 }
  0x8e   : > { %v479_v15 = vpop.permute.xlu0 %478 }
  0xd4   : > { %v456_v9 = vpop.f32.mrf.mxu0 }
  0xd5   : > { %v467_v11 = vmul.f32 2.0, %v456_v9 }
  0xd6   : > { %v458_v10 = vpop.f32.mrf.mxu0 }
  0xd7   : > { %v468_v13 = vmul.f32 2.0, %v458_v10  ;;  %v481_v17 = vsub.f32 %v474_v8, %v467_v11 }
  0xd8   : > { %v462_v12 = vpop.f32.mrf.mxu0 }
  0xd9   : > { %v469_v14 = vmul.f32 2.0, %v462_v12  ;;  %v482_v20 = vsub.f32 %v474_v8, %v468_v13  ;;  %v373_v8 = vld [vmem:[%s1104_s2] sm:$0xf] }
  0xda   : > { %v464_v16 = vpop.f32.mrf.mxu0 }
  0xdb   : > { %v483_v18 = vsub.f32 %v479_v15, %v469_v14  ;;  %v470_v19 = vmul.f32 2.0, %v464_v16 }
  0xdd   : > { %v485_v21 = vmin.f32 %v481_v17, %v483_v18  ;;  %v484_v22 = vsub.f32 %v479_v15, %v470_v19 }
  0xdf   : > { %v486_v23 = vrot.slane %v485_v21, 4  ;;  %v492_v24 = vmin.f32 %v482_v20, %v484_v22 }
  0xe1   : > { %v487_v26 = vmin.f32 %v485_v21, %v486_v23  ;;  %v493_v27 = vrot.slane %v492_v24, 4 }
  0xe3   : > { %v488_v28 = vrot.slane %v487_v26, 2  ;;  %v494_v29 = vmin.f32 %v492_v24, %v493_v27 }
  0xe5   : > { %v489_v31 = vmin.f32 %v487_v26, %v488_v28  ;;  %v495_v32 = vrot.slane %v494_v29, 2 }
  0xe7   : > { %v490_v33 = vrot.slane %v489_v31, 1  ;;  %v496_v34 = vmin.f32 %v494_v29, %v495_v32 }
  0xe9   : > { %v491_v36 = vmin.f32 %v489_v31, %v490_v33  ;;  %v497_v37 = vrot.slane %v496_v34, 1 }
  0xeb   : > { %vm502_vm2 = vcmp.eq.f32.partialorder %v481_v17, %v491_v36  ;;  %vm504_vm3 = vcmp.eq.f32.partialorder %v483_v18, %v491_v36  ;;  %v498_v38 = vmin.f32 %v496_v34, %v497_v37 }
  0xec   : > { %v506_v39 = vsel %vm502_vm2, %v1050_v30, 16  ;;  %v508_v40 = vsel %vm504_vm3, %v501_v35, 16  ;;  %vm544_vm3 = vcmask 130048  }
  0xed   : > { %vm510_vm4 = vcmp.lt.s32.totalorder %v506_v39, %v508_v40  ;;  %vm503_vm5 = vcmp.eq.f32.partialorder %v482_v20, %v498_v38  ;;  %vm505_vm6 = vcmp.eq.f32.partialorder %v484_v22, %v498_v38 }
  0xee   : > { %v511_v41 = vsel %vm510_vm4, %v506_v39, %v508_v40  ;;  %v507_v42 = vsel %vm503_vm5, %v1050_v30, 16  ;;  %v509_v43 = vsel %vm505_vm6, %v501_v35, 16  ;;  %vm641_vm4 = vcmp.lt.s32.totalorder %v499_v25, 256 }
  0xef   : > { %v512_v44 = vrot.slane %v511_v41, 4  ;;  %vm521_vm7 = vcmp.lt.s32.totalorder %v507_v42, %v509_v43  ;;  %vm650_vm5 = vcmask 7168   ;;  %vm671_vm6 = vcmask 0  }
  0xf0   : > { %v522_v45 = vsel %vm521_vm7, %v507_v42, %v509_v43 }
  0xf1   : > { %vm513_vm8 = vcmp.lt.s32.totalorder %v511_v41, %v512_v44  ;;  %v523_v46 = vrot.slane %v522_v45, 4 }
  0xf2   : > { %v514_v47 = vsel %vm513_vm8, %v511_v41, %v512_v44 }
  0xf3   : > { %vm524_vm9 = vcmp.lt.s32.totalorder %v522_v45, %v523_v46  ;;  %v515_v48 = vrot.slane %v514_v47, 2 }
  0xf4   : > { %v525_v51 = vsel %vm524_vm9, %v522_v45, %v523_v46 }
  0xf5   : > { %v526_v52 = vrot.slane %v525_v51, 2  ;;  %vm516_vm10 = vcmp.lt.s32.totalorder %v514_v47, %v515_v48 }
  0xf6   : > { %v517_v53 = vsel %vm516_vm10, %v514_v47, %v515_v48 }
  0xf7   : > { %vm527_vm11 = vcmp.lt.s32.totalorder %v525_v51, %v526_v52  ;;  %v518_v54 = vrot.slane %v517_v53, 1 }
  0xf8   : > { %v528_v56 = vsel %vm527_vm11, %v525_v51, %v526_v52 }
  0xf9   : > { %v529_v57 = vrot.slane %v528_v56, 1  ;;  %vm519_vm12 = vcmp.lt.s32.totalorder %v517_v53, %v518_v54 }
  0xfa   : > { %v520_v58 = vsel %vm519_vm12, %v517_v53, %v518_v54 }
  0xfb   : > { %vm530_vm13 = vcmp.lt.s32.totalorder %v528_v56, %v529_v57  ;;  %vm534_vm14 = vcmp.eq.s32.totalorder %v501_v35, %v520_v58  ;;  %vm532_vm15 = vcmp.eq.s32.totalorder %v1050_v30, %v520_v58 }
  0xfc   : > { %v531_v60 = vsel %vm530_vm13, %v528_v56, %v529_v57  ;;  %v886_v1 = vsel %vm534_vm14, 1.0, %v954_v0  ;;  %v884_v2 = vsel %vm532_vm15, 1.0, %v954_v0 }
  0xfd   : > { %vm535_vm1 = vcmp.eq.s32.totalorder %v501_v35, %v531_v60  ;;  %v624_v61 = vcombine.low %v520_v58, %v531_v60  ;;  %vm533_vm2 = vcmp.eq.s32.totalorder %v1050_v30, %v531_v60 }
  0xfe   : > { %v887_v62 = vsel %vm535_vm1, 1.0, %v954_v0  ;;  %888 = vmatprep.subr.msk.mxu1 %vm535_vm1, %v957_v63  ;;  %v885_v3 = vsel %vm533_vm2, 1.0, %v954_v0 }
  0xff   : > { %889 = vmatpush1.msk.msra.mxu1 %vm534_vm14, %v957_v63  ;;  %v631_v6 = vrot.slane %v624_v61, %v630_v59  ;;  %v647_v7 = vadd.f32 %v887_v62, %v886_v1  ;;  %v644_v9 = vadd.f32 %v885_v3, %v884_v2 }
 0x100   : > { %890 = vmatprep.subr.msk.mxu1 %vm533_vm2, %v957_v63 }
 0x101   : > { %v638_v10 = vrot.slane %v631_v6, %v630_v59  ;;  %648 = vadd.xlane.f32.xlu0 %v647_v7  ;;  %891 = vmatpush1.msk.msra.mxu1 %vm532_vm15, %v957_v63 }
 0x102   : > { %892 = vmatmul.mubr.msk.f32.vlgmr.msra.gmra.mxu1 %vm544_vm3, %v373_v8 }
 0x103   : > { %643 = vst.msk [vmem:[%s356_s22] sm:$0x3] %vm641_vm4, %v638_v10 }
 0x18a   : > { %v649_v0 = vpop.xlane.xlu0 %648 }
 0x18b   : > { %652 = vst.msk [vmem:[%s363_s8 + $0x8] sm:$0xff] %vm650_vm5, %v649_v0 }
 0x1c2   : > { %v614_v11 = vpop.f32.mrf.mxu1 }
 0x1c3   : > { %v654_v12 = vsub.f32 %v614_v11, %v1032_v4 }
 0x1c4   : > { %v616_v13 = vpop.f32.mrf.mxu1 }
 0x1c5   : > { %v656_v14 = vmul.f32 %v654_v12, %v654_v12  ;;  %v621_v15 = vcombine.low %v614_v11, %v616_v13  ;;  %v655_v16 = vsub.f32 %v616_v13, %v1036_v5 }
 0x1c7   : > { %623 = vst [vmem:[%s347_s11] sm:$0xff] %v621_v15  ;;  %v657_v17 = vmul.f32 %v655_v16, %v655_v16  ;;  %v658_v18 = vsel %vm385_vm0, %v656_v14, 0.0 }
 0x1c9   : > { %v659_v19 = vsel %vm385_vm0, %v657_v17, 0.0 }
 0x1ca   : > { %v660_v20 = vadd.f32 %v659_v19, %v658_v18 }
 0x1cc   : > { %661 = vadd.xlane.f32.xlu1 %v660_v20 }
 0x1d0   : > { %645 = vadd.xlane.f32.xlu1 %v644_v9 }
 0x255   : > { %v662_v4 = vpop.xlane.xlu1 %661 }
 0x256   : > { %v663_v21 = vrot.slane %v662_v4, 4 }
 0x258   : > { %v664_v22 = vadd.f32 %v663_v21, %v662_v4 }
 0x259   : > { %v646_v23 = vpop.xlane.xlu1 %645 }
 0x25a   : > { %v665_v24 = vrot.slane %v664_v22, 2  ;;  %651 = vst.msk [vmem:[%s363_s8] sm:$0xff] %vm650_vm5, %v646_v23 }
 0x25c   : > { %v666_v25 = vadd.f32 %v665_v24, %v664_v22 }
 0x25e   : > { %v667_v26 = vrot.slane %v666_v25, 1 }
 0x260   : > { %v668_v5 = vadd.f32 %v667_v26, %v666_v25 }
 0x262   : > { %898 = vpush %v668_v5 }
 0x293   : > { %s899_s14 = spop %898 }
 0x294   : > { %v670_v27 = vstv %s899_s14 }
 0x295   : > { %672 = vst.msk [vmem:[%s368_s13] sm:$0x1] %vm671_vm6, %v670_v27 }
 0x296 PF: > { %s18_s26 = sadd.s32 1, %s952_s26   ;;  %s1110_s24 = smov %s948_s25 }
 0x297   : > { %p15_p5 = scmp.ge.s32.totalorder %s18_s26, 4   ;;  %s1111_s25 = smov %s1113_s27 }
 0x299   :  { %17 = sbr.rel (!%p15_p5) target bundleno = 2 (0x2), region = 102 }

</bundles_post_ra>
